<compile_context>
chip_gen: v7x
topology: tpu7x:2x2x1
jax: 0.10.0
libtpu: 0.0.40
codegen_flags: <defaults>
</compile_context>

<pallas_src>
import functools

import jax
import jax.numpy as jnp
from jax import lax
from jax.experimental import pallas as pl
from jax.experimental.pallas import tpu as pltpu

_LANES = 128     # vreg lane width (last dim)
_SUBLANES = 8    # vreg sublane width (second-to-last dim)


def _round_up(x: int, m: int) -> int:
    return ((x + m - 1) // m) * m


def _uniform_scale_kernel(range_ref, bits_ref, out_ref):
    """uint32 random bits -> Uniform[-1, 1) -> scaled by action_range.

    Exponent trick: take 23 mantissa bits, OR into the bit pattern of 2.0
    (0x40000000) -> float in [2.0, 4.0); subtract 3.0 -> uniform in [-1, 1).
    Pure VPU bitwise + fsub work; no int->float convert, no masked stores
    (last dim is a full multiple of 128 lanes).
    """
    bits = bits_ref[...]                                       # uint32 (R, C)
    mant = lax.shift_right_logical(bits, jnp.uint32(9))        # 23 mantissa bits
    f = lax.bitcast_convert_type(mant | jnp.uint32(0x40000000), jnp.float32)
    out_ref[...] = range_ref[0] * (f - jnp.float32(3.0))


@functools.lru_cache(maxsize=None)
def _build_sampler(rows: int, cols: int):
    """Construct the pallas_call + jitted wrapper once per padded shape."""
    kernel = pl.pallas_call(
        _uniform_scale_kernel,
        out_shape=jax.ShapeDtypeStruct((rows, cols), jnp.float32),
        in_specs=[
            pl.BlockSpec(memory_space=pltpu.MemorySpace.SMEM),  # action_range scalar
            pl.BlockSpec(memory_space=pltpu.MemorySpace.VMEM),  # random bits
        ],
        out_specs=pl.BlockSpec(memory_space=pltpu.MemorySpace.VMEM),
    )

    @jax.jit
    def sampler(key, action_range):
        bits = jax.random.bits(key, (rows, cols), dtype=jnp.uint32)
        rng = jnp.reshape(action_range.astype(jnp.float32), (1,))
        return kernel(rng, bits)

    return sampler


def sample_actions_pallas(key, batch: int, action_dim: int, action_range) -> jax.Array:
    """Sample `batch` action vectors ~ action_range * Uniform(-1, 1)."""
    rows = _round_up(max(int(batch), 1), _SUBLANES)
    cols = _round_up(max(int(action_dim), 1), _LANES)
    sampler = _build_sampler(rows, cols)
    out = sampler(key, jnp.asarray(action_range, dtype=jnp.float32))
    return out[:batch, :action_dim]


class _Space:
    """Minimal stand-in for a gym space (only .shape / .n are used)."""

    def __init__(self, shape=(), n=None):
        self.shape = shape
        self.n = n


class PolicyNetworkBase:
    """JAX/Pallas port of the PyTorch base policy network."""

    def __init__(self, state_space, action_space, action_range):
        self._state_space = state_space
        self._state_shape = state_space.shape
        if len(self._state_shape) == 1:
            self._state_dim = self._state_shape[0]
        else:
            pass
        self._action_space = action_space
        self._action_shape = action_space.shape
        if len(self._action_shape) < 1:
            self._action_dim = action_space.n
        else:
            self._action_dim = self._action_shape[0]
        self.action_range = action_range

    # TODO(synk): forward()/evaluate()/get_action() are empty in the base class
    # (no compute to translate); concrete subclasses define the hot path.
    def forward(self):
        pass

    def evaluate(self):
        pass

    def get_action(self):
        pass

    def sample_action(self, key) -> jax.Array:
        """Single action: action_range * Uniform(-1, 1), shape (action_dim,)."""
        out = sample_actions_pallas(key, 1, self._action_dim, float(self.action_range))
        return out.reshape((self._action_dim,))

    def sample_actions(self, key, batch: int) -> jax.Array:
        """Batched actions, shape (batch, action_dim) — one kernel launch."""
        return sample_actions_pallas(key, batch, self._action_dim, float(self.action_range))


if __name__ == "__main__":
    # Deterministic small setup: state_dim=16, action_dim=8, action_range=2.0
    key = jax.random.PRNGKey(0)
    k1, k2 = jax.random.split(key)

    state_space = _Space(shape=(16,))
    action_space = _Space(shape=(8,))
    policy = PolicyNetworkBase(state_space, action_space, action_range=2.0)

    # Single-sample path (matches torch sample_action semantics).
    action = jax.block_until_ready(policy.sample_action(k1))
    assert action.shape == (8,)
    assert action.dtype == jnp.float32
    assert bool(jnp.all(jnp.abs(action) <= 2.0))

    # Batched path (amortizes launch overhead across rows).
    batch_actions = jax.block_until_ready(policy.sample_actions(k2, batch=4))
    assert batch_actions.shape == (4, 8)
    assert batch_actions.dtype == jnp.float32
    assert bool(jnp.all(jnp.abs(batch_actions) <= 2.0))
    # Rows should differ (no collapsed / reused seed).
    assert bool(jnp.any(batch_actions[0] != batch_actions[1]))

    print("KERNEL_OK")
</pallas_src>

<mosaic_0001>
module attributes {stable_mosaic.version = 11 : i64} {
  func.func @_uniform_scale_kernel(%arg0: memref<1xf32, #tpu.memory_space<smem>>, %arg1: memref<8x128xi32, #tpu.memory_space<vmem>>, %arg2: memref<8x128xf32, #tpu.memory_space<vmem>>) attributes {dimension_semantics = [], scalar_prefetch = 0 : i64, scratch_operands = 0 : i64, tpu.core_type = #tpu.core_type<tc>} {
    %c0 = arith.constant 0 : index
    %c0_0 = arith.constant 0 : index
    %0 = vector.load %arg1[%c0, %c0_0] : memref<8x128xi32, #tpu.memory_space<vmem>>, vector<8x128xi32>
    %c9_i32 = arith.constant 9 : i32
    %1 = vector.broadcast %c9_i32 : i32 to vector<8x128xi32>
    %2 = arith.shrui %0, %1 : vector<8x128xi32>
    %c1073741824_i32 = arith.constant 1073741824 : i32
    %3 = vector.broadcast %c1073741824_i32 : i32 to vector<8x128xi32>
    %4 = arith.ori %2, %3 : vector<8x128xi32>
    %5 = tpu.bitcast %4 : vector<8x128xi32> -> vector<8x128xf32>
    %c0_1 = arith.constant 0 : index
    %6 = memref.load %arg0[%c0_1] : memref<1xf32, #tpu.memory_space<smem>>
    %cst = arith.constant 3.000000e+00 : f32
    %7 = vector.broadcast %cst : f32 to vector<8x128xf32>
    %8 = arith.subf %5, %7 : vector<8x128xf32>
    %9 = vector.broadcast %6 : f32 to vector<8x128xf32>
    %10 = arith.mulf %9, %8 : vector<8x128xf32>
    %c0_2 = arith.constant 0 : index
    %c0_3 = arith.constant 0 : index
    %11 = vector.load %arg2[%c0_2, %c0_3] : memref<8x128xf32, #tpu.memory_space<vmem>>, vector<8x128xf32>
    tpu.vector_store %arg2[%c0_2, %c0_3], %10 {strides = array<i32>} : memref<8x128xf32, #tpu.memory_space<vmem>>, vector<8x128xf32>,
    return
  }
}

</mosaic_0001>

<bundles_post_ra>
// kernel: sampler.1
= control target key start
LH: loop header
LB: loop body
LE: loop exit
PB: predicated region body
PF: predicated region fallthrough
CT: control target
= control target key end

     0   :  { %s96_s0 = inlined_call_operand.<no memory space> [shape: f32[1], index: 0, kind: input, shape index: {}]   ;;  %s97_s1 = inlined_call_operand.vmem [shape: u32[8,128], index: 1, kind: input, shape index: {}]   ;;  %s98_s2 = inlined_call_operand.hbm [shape: f32[8,128], index: 2, kind: output, shape index: {}]  }
   0x1   :  { %v13_v0 = vld [vmem:[%s97_s1] sm:$0xff] }
   0x2   :  { %8 = vsyncpa [#allocation4], 0  ;;  %v14_v1 = vshrl.u32 %v13_v0, 9  ;;  %v19_v3 = vstv %s96_s0  ;;  %s62_s13 = smov [#allocation3]  }
   0x3   :  { %s28_s14 = sshll.u32 %s62_s13, 4  ;;  %s29_s14 = int_to_ptr.vmem [resolvable:$true] %s28_s14 }
   0x4   :  { %v15_v2 = vor.u32 1073741824, %v14_v1  ;;  %s38_s15 = scalar_lea.vmem %s29_s14, 128  ;;  %p43_p1 = scmp.lt.s32.totalorder %s29_s14, %s29_s14 }
   0x5   :  { %p39_p0 = scmp.ne.s32.totalorder %s29_s14, %s38_s15  ;;  %p44_p2 = scmp.lt.s32.totalorder %s38_s15, %s38_s15 }
   0x6   :  { %v36_v4 = vadd.f32 -3.0, %v15_v2 }
   0x7   :  { %p45_p3 = por %p44_p2, %p43_p1 }
   0x8   :  { %v20_v5 = vmul.f32 %v36_v4, %v19_v3 }
   0x9   :  { %p46_p4 = pnand %p45_p3, %p39_p0 }
   0xa   :  { %21 = vst [vmem:[#allocation3] sm:$0xff] %v20_v5 }
   0xb   :  { %49 = shalt.err (!%p46_p4)
}
   0xc   :  { %s50_s17 = scalar_lea.hbm %s98_s2, 128 }
   0xd   :  { %p51_p5 = scmp.ne.s32.totalorder %s98_s2, %s50_s17  ;;  %p54_p6 = scmp.lt.u32.totalorder %s50_s17, %s98_s2 }
   0xf   :  { %p56_p7 = pnand %p54_p6, %p51_p5 }
  0x11   :  { %59 = shalt.err (!%p56_p7)
}
  0x12   :  { %31 = dma.vmem_to_hbm [thread:$0]  %s29_s14, 128, %s98_s2, [#allocation4]  }
  0x13   :  { %60 = dma.done.wait [#allocation4], 128  }
  0x14   :  { %61 = vsyncadd [#allocation4], 4294967168 }
  0x15   :  { %35 = vsyncpa [#allocation4], 1 }

</bundles_post_ra>
